<compile_context>
chip_gen: v5e
topology: v5e:2x2
jax: 0.10.0
libtpu: 0.0.40
codegen_flags: <defaults>
</compile_context>

<pallas_src>
import math

import jax
import jax.numpy as jnp
from jax.experimental import pallas as pl
from jax.experimental.pallas import tpu as pltpu

INF = 100000000.0
TOPK = 9

# focal-loss hyper-parameters (GLIPLoss.__init__)
CLS_ALPHA, CLS_GAMMA = 0.25, 2.0
TOK_ALPHA, TOK_GAMMA = 0.25, 2.0

# deterministic box coder (maskrcnn-benchmark BoxCoder, weights (10,10,5,5))
WX, WY, WW, WH = 10.0, 10.0, 5.0, 5.0
BBOX_XFORM_CLIP = math.log(1000.0 / 16.0)

N_SPLIT = 2        # leading "parallel" grid axis -> 2-way megacore split on v7x
_ROW_ALIGN = 16    # sublane alignment safe for both f32 and bf16 blocks


def _round_up(x, m):
    return (x + m - 1) // m * m


_VMEM_LIMIT_CACHE = None


def _vmem_limit_bytes():
    """Per-generation scoped-VMEM limit: ~75% of physical, capped at 96 MiB."""
    global _VMEM_LIMIT_CACHE
    if _VMEM_LIMIT_CACHE is None:
        try:
            cap = int(pltpu.get_tpu_info().vmem_capacity_bytes)
        except Exception:
            cap = 128 * 1024 * 1024
        _VMEM_LIMIT_CACHE = max(32 * 1024 * 1024,
                                min(cap * 3 // 4, 96 * 1024 * 1024))
    return _VMEM_LIMIT_CACHE


def _pad_width(d):
    """Pad a class/token width so the fold factor stays bounded (W == 128 or d128)."""
    if d <= 128:
        for cand in (8, 16, 32, 64, 128):
            if d <= cand:
                return cand
    # TODO(synk): for extremely large token widths (> ~8K) the lane axis should be
    # chunked across an extra grid dimension instead of held in a single block.
    return _round_up(d, 128)


def _max_tile_rows(bytes_per_row, budget=8 * 1024 * 1024, cap=4096):
    t = max(_ROW_ALIGN, min(cap, budget // max(bytes_per_row, 1)))
    return max(_ROW_ALIGN, t // _ROW_ALIGN * _ROW_ALIGN)


def _split_tiles(rows, max_tile):
    """Pad `rows` so it splits into N_SPLIT equal halves of n_chunks tiles each."""
    rows_a = _round_up(max(rows, 1), _ROW_ALIGN)
    per = -(-rows_a // N_SPLIT)
    n_chunks = max(1, -(-per // max_tile))
    tile = _round_up(-(-per // n_chunks), _ROW_ALIGN)
    return N_SPLIT * n_chunks * tile, tile, n_chunks


def _fold8(v):
    """(tile, W) -> (8, W) by summing vreg-aligned 8-row blocks (pure VALU adds)."""
    return v.reshape(v.shape[0] // 8, 8, v.shape[1]).sum(axis=0)


# ----------------------------------------------------------------------------
# Pallas kernel 1: classification sigmoid focal loss, sum-reduced
# layout: logits (Na, C) folded to (rows, k*C_pad); a single bf16 code plane
# (0 = ignore, 1 = positive, 2 = negative) replaces the f32 label broadcast.
# ----------------------------------------------------------------------------
def _cls_focal_kernel(x_ref, code_ref, out_ref, acc_ref):
    i = pl.program_id(1)

    @pl.when(i == 0)
    def _():
        acc_ref[...] = jnp.zeros_like(acc_ref)

    x = x_ref[...].astype(jnp.float32)        # (tile, W)
    c = code_ref[...].astype(jnp.float32)     # (tile, W)  0 / 1 / 2

    # NOTE: eps-guarded logs kept to match the PyTorch reference; gamma==2 -> squares
    p = jax.nn.sigmoid(x)
    one_m_p = 1.0 - p
    term1 = one_m_p * one_m_p * jnp.log(p + 1e-6)
    term2 = p * p * jnp.log(1.0 - p + 1e-6)
    pos = (c == 1.0).astype(jnp.float32)
    neg = (c == 2.0).astype(jnp.float32)
    loss = -pos * term1 * CLS_ALPHA - neg * term2 * (1.0 - CLS_ALPHA)
    acc_ref[...] += _fold8(loss)

    @pl.when(i == pl.num_programs(1) - 1)
    def _():
        out_ref[0] = jnp.sum(acc_ref[...], keepdims=True)


def cls_focal_loss_sum(logits, labels):
    Na, C = logits.shape
    C_pad = _pad_width(C)
    k = 128 // math.gcd(C_pad, 128)            # fold factor: k*C_pad multiple of 128
    W = k * C_pad
    rows = -(-Na // k)
    rows_pad, tile, n_chunks = _split_tiles(rows, _max_tile_rows(6 * W))
    n_full = rows_pad * k

    # precompute pos/neg code on host (reference: t==cls / (t!=cls & t>=0))
    class_range = jnp.arange(1, C + 1, dtype=jnp.int32)[None, :]
    lab = labels.astype(jnp.int32)[:, None]
    pos = (lab == class_range)
    neg = jnp.logical_and(lab != class_range, lab >= 0)
    code = (pos.astype(jnp.int32) + 2 * neg.astype(jnp.int32)).astype(jnp.bfloat16)

    x = logits
    if C_pad != C:
        x = jnp.pad(x, ((0, 0), (0, C_pad - C)))
        code = jnp.pad(code, ((0, 0), (0, C_pad - C)))     # code 0 -> zero loss
    if n_full != Na:
        x = jnp.pad(x, ((0, n_full - Na), (0, 0)))
        code = jnp.pad(code, ((0, n_full - Na), (0, 0)))   # code 0 -> zero loss

    x = x.reshape(rows_pad, W)
    code = code.reshape(rows_pad, W)

    out = pl.pallas_call(
        _cls_focal_kernel,
        out_shape=jax.ShapeDtypeStruct((N_SPLIT, 1, 1), jnp.float32),
        grid=(N_SPLIT, n_chunks),
        in_specs=[pl.BlockSpec((tile, W), lambda p, i: (p * n_chunks + i, 0)),
                  pl.BlockSpec((tile, W), lambda p, i: (p * n_chunks + i, 0))],
        out_specs=pl.BlockSpec((1, 1, 1), lambda p, i: (p, 0, 0)),
        scratch_shapes=[pltpu.VMEM((8, W), jnp.float32)],
        compiler_params=pltpu.CompilerParams(
            dimension_semantics=("parallel", "arbitrary"),
            vmem_limit_bytes=_vmem_limit_bytes()),
    )(x, code)
    return jnp.sum(out)     # per-core partials summed in JAX


# ----------------------------------------------------------------------------
# Pallas kernel 2: token sigmoid binary focal loss (masked, sum-reduced)
# layout: (bs, n, T) folded to (bs, rows, k*T_pad); targets / mask travel as bf16;
# the mask stays (bs, 1, W) in HBM and is broadcast inside the kernel.
# ----------------------------------------------------------------------------
def _token_focal_kernel(x_ref, t_ref, m_ref, out_ref, acc_ref):
    i = pl.program_id(2)

    @pl.when(i == 0)
    def _():
        acc_ref[...] = jnp.zeros_like(acc_ref)

    x = x_ref[0].astype(jnp.float32)          # (tile, W)
    t = t_ref[0].astype(jnp.float32)          # (tile, W)
    m = m_ref[0].astype(jnp.float32)          # (1, W), broadcast over the tile rows

    e = jnp.exp(-jnp.abs(x))                  # one exp reused for sigmoid + BCE term
    inv = pl.reciprocal(1.0 + e, approx=True)               # EUP vrcp
    p = jnp.where(x >= 0.0, inv, e * inv)                    # sigmoid(x)
    ce = jnp.maximum(x, 0.0) - x * t + jnp.log(1.0 + e)      # BCE-with-logits (stable)
    one_m_pt = 1.0 - (p * t + (1.0 - p) * (1.0 - t))
    alpha_t = TOK_ALPHA * t + (1.0 - TOK_ALPHA) * (1.0 - t)
    loss = alpha_t * ce * one_m_pt * one_m_pt * m
    acc_ref[...] += _fold8(loss)

    @pl.when(i == pl.num_programs(2) - 1)
    def _():
        out_ref[0] = jnp.sum(acc_ref[...], keepdims=True)


def token_focal_loss_sum(dot_logits, token_labels, text_masks):
    bs, n, T = dot_logits.shape
    T_pad = _pad_width(T)
    k = 128 // math.gcd(T_pad, 128)
    W = k * T_pad
    rows = -(-n // k)
    bpr = W * (dot_logits.dtype.itemsize + 2)      # logits + bf16 targets per row
    rows_pad, tile, n_chunks = _split_tiles(rows, _max_tile_rows(bpr))
    n_full = rows_pad * k

    x = dot_logits                                  # keep producer dtype in HBM
    t = token_labels.astype(jnp.bfloat16)           # exact 0/1 -> halve HBM bytes
    tm = (text_masks > 0).astype(jnp.bfloat16)
    if T_pad != T:
        x = jnp.pad(x, ((0, 0), (0, 0), (0, T_pad - T)))
        t = jnp.pad(t, ((0, 0), (0, 0), (0, T_pad - T)))
        tm = jnp.pad(tm, ((0, 0), (0, T_pad - T)))           # mask 0 -> zero loss
    if n_full != n:
        # padded anchor rows: very negative logits, zero targets -> zero focal loss
        x = jnp.pad(x, ((0, 0), (0, n_full - n), (0, 0)), constant_values=-100.0)
        t = jnp.pad(t, ((0, 0), (0, n_full - n), (0, 0)))

    x = x.reshape(bs, rows_pad, W)
    t = t.reshape(bs, rows_pad, W)
    m = jnp.tile(tm, (1, k)).reshape(bs, 1, W)

    out = pl.pallas_call(
        _token_focal_kernel,
        out_shape=jax.ShapeDtypeStruct((N_SPLIT * bs, 1, 1), jnp.float32),
        grid=(N_SPLIT, bs, n_chunks),
        in_specs=[pl.BlockSpec((1, tile, W), lambda p, b, i: (b, p * n_chunks + i, 0)),
                  pl.BlockSpec((1, tile, W), lambda p, b, i: (b, p * n_chunks + i, 0)),
                  pl.BlockSpec((1, 1, W), lambda p, b, i: (b, 0, 0))],
        out_specs=pl.BlockSpec((1, 1, 1), lambda p, b, i: (p * bs + b, 0, 0)),
        scratch_shapes=[pltpu.VMEM((8, W), jnp.float32)],
        compiler_params=pltpu.CompilerParams(
            dimension_semantics=("parallel", "parallel", "arbitrary"),
            vmem_limit_bytes=_vmem_limit_bytes()),
    )(x, t, m)
    return jnp.sum(out)     # per-core / per-batch partials summed in JAX


# ----------------------------------------------------------------------------
# Pallas kernel 3: box decode + GIoU loss + centerness targets + centerness BCE
# layout: (14, Na/128, 128) channel planes -> every channel slice is a full
#   (tile, 128) vreg block.  channels: 0-3 pred deltas, 4-7 target deltas,
#   8-11 anchor box, 12 centerness logit, 13 positive mask.
# ----------------------------------------------------------------------------
def _decode(dx, dy, dw, dh, ax1, ay1, ax2, ay2):
    w = ax2 - ax1 + 1.0
    h = ay2 - ay1 + 1.0
    cx = ax1 + 0.5 * w
    cy = ay1 + 0.5 * h
    ddx = dx / WX
    ddy = dy / WY
    ddw = jnp.minimum(dw / WW, BBOX_XFORM_CLIP)
    ddh = jnp.minimum(dh / WH, BBOX_XFORM_CLIP)
    pcx = ddx * w + cx
    pcy = ddy * h + cy
    pw = jnp.exp(ddw) * w
    ph = jnp.exp(ddh) * h
    return (pcx - 0.5 * pw, pcy - 0.5 * ph,
            pcx + 0.5 * pw - 1.0, pcy + 0.5 * ph - 1.0)


def _reg_ctr_kernel(d_ref, giou_w_ref, giou_u_ref, bce_ref, wsum_ref,
                    acc_w, acc_u, acc_b, acc_s):
    i = pl.program_id(1)

    @pl.when(i == 0)
    def _():
        acc_w[...] = jnp.zeros_like(acc_w)
        acc_u[...] = jnp.zeros_like(acc_u)
        acc_b[...] = jnp.zeros_like(acc_b)
        acc_s[...] = jnp.zeros_like(acc_s)

    ax1, ay1, ax2, ay2 = d_ref[8], d_ref[9], d_ref[10], d_ref[11]
    ctr_logit = d_ref[12]
    pos = d_ref[13]                           # 0/1 mask (labels > 0)

    # --- GIoU loss -----------------------------------------------------------
    px1, py1, px2, py2 = _decode(d_ref[0], d_ref[1], d_ref[2], d_ref[3],
                                 ax1, ay1, ax2, ay2)
    px2 = jnp.maximum(px1, px2)
    py2 = jnp.maximum(py1, py2)
    pred_area = (px2 - px1) * (py2 - py1)

    gx1, gy1, gx2, gy2 = _decode(d_ref[4], d_ref[5], d_ref[6], d_ref[7],
                                 ax1, ay1, ax2, ay2)
    tgt_area = (gx2 - gx1) * (gy2 - gy1)

    x1i = jnp.maximum(px1, gx1); y1i = jnp.maximum(py1, gy1)
    x2i = jnp.minimum(px2, gx2); y2i = jnp.minimum(py2, gy2)
    has_inter = jnp.logical_and(y2i > y1i, x2i > x1i)
    area_i = jnp.where(has_inter, (x2i - x1i) * (y2i - y1i), 0.0)

    x1e = jnp.minimum(px1, gx1); y1e = jnp.minimum(py1, gy1)
    x2e = jnp.maximum(px2, gx2); y2e = jnp.maximum(py2, gy2)
    area_e = (x2e - x1e) * (y2e - y1e) + 1e-7
    area_u = pred_area + tgt_area - area_i + 1e-7
    # approx EUP reciprocals instead of exact VALU divides (per perf review)
    ious = area_i * pl.reciprocal(area_u, approx=True)
    gious = ious - (area_e - area_u) * pl.reciprocal(area_e, approx=True)
    giou_losses = 1.0 - gious

    # --- centerness targets (compute_centerness_targets) ---------------------
    acx = (ax2 + ax1) * 0.5
    acy = (ay2 + ay1) * 0.5
    l = acx - gx1
    t = acy - gy1
    r = gx2 - acx
    b = gy2 - acy
    lr_min = jnp.minimum(l, r); lr_max = jnp.maximum(l, r)
    tb_min = jnp.minimum(t, b); tb_max = jnp.maximum(t, b)
    lr_max_s = jnp.where(lr_max != 0.0, lr_max, 1.0)
    tb_max_s = jnp.where(tb_max != 0.0, tb_max, 1.0)
    prod = ((lr_min * pl.reciprocal(lr_max_s, approx=True))
            * (tb_min * pl.reciprocal(tb_max_s, approx=True)))
    ctr_tgt = jnp.where(pos > 0.0, jnp.sqrt(jnp.maximum(prod, 0.0)), 0.0)

    # --- centerness BCE-with-logits ------------------------------------------
    bce = (jnp.maximum(ctr_logit, 0.0) - ctr_logit * ctr_tgt
           + jnp.log(1.0 + jnp.exp(-jnp.abs(ctr_logit))))

    gl_pos = pos * giou_losses
    acc_w[...] += _fold8(gl_pos * ctr_tgt)
    acc_u[...] += _fold8(gl_pos)
    acc_b[...] += _fold8(pos * bce)
    acc_s[...] += _fold8(pos * ctr_tgt)

    @pl.when(i == pl.num_programs(1) - 1)
    def _():
        giou_w_ref[0] = jnp.sum(acc_w[...], keepdims=True)
        giou_u_ref[0] = jnp.sum(acc_u[...], keepdims=True)
        bce_ref[0] = jnp.sum(acc_b[...], keepdims=True)
        wsum_ref[0] = jnp.sum(acc_s[...], keepdims=True)


def reg_and_centerness_sums(pred4, tgt4, anc4, ctr_logits, pos_mask):
    # pred4 / tgt4 / anc4: (4, Na);  ctr_logits / pos_mask: (Na,)
    Na = pred4.shape[1]
    f32 = jnp.float32
    rows = -(-Na // 128)
    rows_pad, tile, n_chunks = _split_tiles(rows, _max_tile_rows(14 * 128 * 4, cap=512))
    na_pad = rows_pad * 128

    packed = jnp.concatenate([
        pred4.astype(f32), tgt4.astype(f32), anc4.astype(f32),
        ctr_logits.reshape(1, Na).astype(f32),
        pos_mask.reshape(1, Na).astype(f32)], axis=0)             # (14, Na)
    if na_pad != Na:
        packed = jnp.pad(packed, ((0, 0), (0, na_pad - Na)))      # pos=0 -> zero loss
    packed = packed.reshape(14, rows_pad, 128)

    outs = pl.pallas_call(
        _reg_ctr_kernel,
        out_shape=tuple(jax.ShapeDtypeStruct((N_SPLIT, 1, 1), f32) for _ in range(4)),
        grid=(N_SPLIT, n_chunks),
        in_specs=[pl.BlockSpec((14, tile, 128), lambda p, i: (0, p * n_chunks + i, 0))],
        out_specs=tuple(pl.BlockSpec((1, 1, 1), lambda p, i: (p, 0, 0))
                        for _ in range(4)),
        scratch_shapes=[pltpu.VMEM((8, 128), f32) for _ in range(4)],
        compiler_params=pltpu.CompilerParams(
            dimension_semantics=("parallel", "arbitrary"),
            vmem_limit_bytes=_vmem_limit_bytes()),
    )(packed)
    return tuple(jnp.sum(o) for o in outs)      # per-core partials summed in JAX


# ----------------------------------------------------------------------------
# Plain-JAX glue: box coder, IoU, ATSS target assignment, layer flattening
# ----------------------------------------------------------------------------
def box_encode4(gt, anchors):
    """BoxCoder.encode, returning (4, A) directly (kernel-3 layout)."""
    TO_REMOVE = 1.0
    ex_w = anchors[:, 2] - anchors[:, 0] + TO_REMOVE
    ex_h = anchors[:, 3] - anchors[:, 1] + TO_REMOVE
    ex_cx = anchors[:, 0] + 0.5 * ex_w
    ex_cy = anchors[:, 1] + 0.5 * ex_h
    gt_w = gt[:, 2] - gt[:, 0] + TO_REMOVE
    gt_h = gt[:, 3] - gt[:, 1] + TO_REMOVE
    gt_cx = gt[:, 0] + 0.5 * gt_w
    gt_cy = gt[:, 1] + 0.5 * gt_h
    dx = WX * (gt_cx - ex_cx) / ex_w
    dy = WY * (gt_cy - ex_cy) / ex_h
    dw = WW * jnp.log(gt_w / ex_w)
    dh = WH * jnp.log(gt_h / ex_h)
    return jnp.stack([dx, dy, dw, dh], axis=0)


def boxlist_iou(a, b):
    TO_REMOVE = 1.0
    area1 = (a[:, 2] - a[:, 0] + TO_REMOVE) * (a[:, 3] - a[:, 1] + TO_REMOVE)
    area2 = (b[:, 2] - b[:, 0] + TO_REMOVE) * (b[:, 3] - b[:, 1] + TO_REMOVE)
    lt = jnp.maximum(a[:, None, :2], b[None, :, :2])
    rb = jnp.minimum(a[:, None, 2:], b[None, :, 2:])
    wh = jnp.maximum(rb - lt + TO_REMOVE, 0.0)
    inter = wh[..., 0] * wh[..., 1]
    return inter / (area1[:, None] + area2[None, :] - inter)


def assign_targets_per_image(gt_boxes, gt_labels, token_map, anchors_levels):
    # TODO(synk): ATSS assignment (topk / IoU matching / scatter / gathers) is
    # data-dependent control flow; kept in plain JAX rather than a Pallas kernel.
    anchors = jnp.concatenate(anchors_levels, axis=0)          # (A, 4)
    A = anchors.shape[0]
    G = gt_boxes.shape[0]
    T = token_map.shape[1]

    ious = boxlist_iou(anchors, gt_boxes)                      # (A, G)

    gt_cx = (gt_boxes[:, 2] + gt_boxes[:, 0]) / 2.0
    gt_cy = (gt_boxes[:, 3] + gt_boxes[:, 1]) / 2.0
    a_cx = (anchors[:, 2] + anchors[:, 0]) / 2.0
    a_cy = (anchors[:, 3] + anchors[:, 1]) / 2.0
    dist = jnp.sqrt((a_cx[:, None] - gt_cx[None, :]) ** 2
                    + (a_cy[:, None] - gt_cy[None, :]) ** 2)   # (A, G)

    cand = []
    start = 0
    for lvl in anchors_levels:
        n = lvl.shape[0]
        k = min(TOPK, n)                                       # num_anchors_per_loc == 1
        d = dist[start:start + n]                              # (n, G)
        _, idx = jax.lax.top_k(-d.T, k)                        # (G, k) smallest distances
        cand.append(idx.T + start)
        start += n
    cand = jnp.concatenate(cand, axis=0)                       # (K, G)

    cand_ious = jnp.take_along_axis(ious, cand, axis=0)        # (K, G)
    thr = cand_ious.mean(axis=0) + jnp.std(cand_ious, axis=0, ddof=1)
    is_pos = cand_ious >= thr[None, :]

    cand_cx = a_cx[cand]
    cand_cy = a_cy[cand]
    l = cand_cx - gt_boxes[:, 0][None, :]
    t = cand_cy - gt_boxes[:, 1][None, :]
    r = gt_boxes[:, 2][None, :] - cand_cx
    b = gt_boxes[:, 3][None, :] - cand_cy
    in_gt = jnp.minimum(jnp.minimum(l, t), jnp.minimum(r, b)) > 0.01
    is_pos = is_pos & in_gt

    flat_idx = (cand + jnp.arange(G, dtype=cand.dtype)[None, :] * A).reshape(-1)
    pos_flat = jnp.zeros((G * A,), dtype=bool).at[flat_idx].set(is_pos.reshape(-1))
    ious_inf = jnp.where(pos_flat, ious.T.reshape(-1), -INF).reshape(G, A).T  # (A, G)

    vals = jnp.max(ious_inf, axis=1)
    idxs = jnp.argmax(ious_inf, axis=1)

    cls = jnp.where(vals == -INF, jnp.zeros_like(gt_labels[idxs]), gt_labels[idxs])
    unmatched = jnp.zeros((T,), token_map.dtype).at[-1].set(1.0)
    tok = jnp.where((vals == -INF)[:, None], unmatched[None, :], token_map[idxs])
    matched = gt_boxes[idxs]
    reg = box_encode4(matched, anchors)                        # (4, A)
    return cls, reg, tok


def glip_loss_forward(logits, bbox_reg, centerness, dot_product_logits,
                      targets, anchors, captions=None, compute_cls_loss=False):
    N = len(targets)
    C = logits[0].shape[1]            # 1 anchor per location

    # ---- prepare_targets (ATSS) ----
    labels, reg_targets, token_labels = [], [], []
    for i in range(N):
        cls_i, reg_i, tok_i = assign_targets_per_image(
            targets[i]['boxes'], targets[i]['labels'],
            targets[i]['positive_map'], anchors[i])
        labels.append(cls_i)
        reg_targets.append(reg_i)                              # (4, A)
        token_labels.append(tok_i)

    # ---- flatten predictions (build kernel layouts directly from NCHW) ----
    box_reg_4 = jnp.transpose(
        jnp.concatenate([r.reshape(N, 4, -1) for r in bbox_reg], axis=2),
        (1, 0, 2)).reshape(4, -1)                              # (4, Na)
    ctr_flat = jnp.concatenate([c.reshape(N, -1) for c in centerness],
                               axis=1).reshape(-1)             # (Na,)
    dot_logits = jnp.concatenate(dot_product_logits, axis=1)   # (N, nA, T)

    labels_flat = jnp.concatenate(labels, axis=0)              # (Na,)
    reg_tgt_4 = jnp.concatenate(reg_targets, axis=1)           # (4, Na)
    anchors_4 = jnp.concatenate(
        [jnp.concatenate(a, axis=0) for a in anchors], axis=0).T   # (4, Na)
    token_labels_stacked = jnp.stack(token_labels, axis=0)     # (N, nA, T)
    text_masks = jnp.stack([t['attention_mask'] for t in targets], axis=0)

    num_pos = jnp.sum(labels_flat > 0).astype(jnp.float32)
    num_pos_avg = jnp.maximum(num_pos, 1.0)

    # ---- classification focal loss (reference multiplies it by 0.0, so the
    #      kernel is gated off by default to avoid dead compute) ----
    if compute_cls_loss:
        box_cls_flat = jnp.concatenate(
            [jnp.transpose(l, (0, 2, 3, 1)).reshape(N, -1, C) for l in logits],
            axis=1).reshape(-1, C)
        cls_loss = cls_focal_loss_sum(box_cls_flat, labels_flat) / num_pos_avg
    else:
        cls_loss = jnp.float32(0.0)

    # ---- token focal loss (Pallas) ----
    token_sum = token_focal_loss_sum(dot_logits, token_labels_stacked, text_masks)

    # ---- GIoU + centerness (Pallas, masked over positives) ----
    pos_mask = (labels_flat > 0).astype(jnp.float32)
    giou_w, giou_u, bce_sum, wsum = reg_and_centerness_sums(
        box_reg_4, reg_tgt_4, anchors_4, ctr_flat, pos_mask)
    # GIoULoss: weighted sum if weight.sum() > 0 else unweighted sum (matches the
    # reference module exactly; no extra normalization)
    reg_loss = jnp.where(wsum > 0.0, giou_w, giou_u)
    # reference divides by len(centerness_targets) == num_pos; guard empty positives
    centerness_loss = jnp.where(num_pos > 0.0, bce_sum / num_pos_avg, 0.0)

    return {'loss_cls': cls_loss * 0.0,
            'loss_reg': reg_loss,
            'loss_centerness': centerness_loss,
            'loss_dot_product_token': token_sum * 2.0}


# ----------------------------------------------------------------------------
# Deterministic example setup
# ----------------------------------------------------------------------------
def make_anchors(fm_size, stride, box_size):
    ys, xs = jnp.meshgrid(jnp.arange(fm_size), jnp.arange(fm_size), indexing='ij')
    cx = (xs.reshape(-1).astype(jnp.float32) + 0.5) * stride
    cy = (ys.reshape(-1).astype(jnp.float32) + 0.5) * stride
    half = box_size / 2.0
    return jnp.stack([cx - half, cy - half, cx + half - 1.0, cy + half - 1.0], axis=1)


if __name__ == "__main__":
    key = jax.random.PRNGKey(0)
    N = 2          # batch (images)
    C = 4          # num classes
    T = 8          # token length
    G = 3          # gt boxes per image
    fm_sizes = [8, 4]
    strides = [8, 16]
    anchor_sizes = [32.0, 64.0]

    anchors_levels = [make_anchors(s, st, a)
                      for s, st, a in zip(fm_sizes, strides, anchor_sizes)]
    anchors = [anchors_levels, anchors_levels]          # same anchors for each image

    keys = jax.random.split(key, 8)
    logits = [0.1 * jax.random.normal(keys[0], (N, C, 8, 8), jnp.float32),
              0.1 * jax.random.normal(keys[1], (N, C, 4, 4), jnp.float32)]
    bbox_reg = [jax.random.normal(keys[2], (N, 4, 8, 8), jnp.float32),
                jax.random.normal(keys[3], (N, 4, 4, 4), jnp.float32)]
    centerness = [jax.random.normal(keys[4], (N, 1, 8, 8), jnp.float32),
                  jax.random.normal(keys[5], (N, 1, 4, 4), jnp.float32)]
    dot_product_logits = [0.1 * jax.random.normal(keys[6], (N, 64, T), jnp.float32),
                          0.1 * jax.random.normal(keys[7], (N, 16, T), jnp.float32)]

    gt0 = jnp.array([[4., 4., 28., 28.], [30., 10., 60., 40.], [8., 36., 40., 62.]],
                    jnp.float32)
    gt1 = jnp.array([[2., 2., 34., 30.], [20., 24., 58., 58.], [36., 4., 62., 26.]],
                    jnp.float32)
    lab0 = jnp.array([1, 2, 3], jnp.int32)
    lab1 = jnp.array([2, 4, 1], jnp.int32)
    pm0 = jnp.zeros((G, T), jnp.float32).at[jnp.arange(G), jnp.arange(G)].set(1.0)
    pm1 = jnp.zeros((G, T), jnp.float32).at[jnp.arange(G), jnp.arange(G) + 3].set(1.0)
    am = jnp.array([1, 1, 1, 1, 1, 1, 0, 1], jnp.float32)

    targets = [
        {'boxes': gt0, 'labels': lab0, 'positive_map': pm0, 'attention_mask': am},
        {'boxes': gt1, 'labels': lab1, 'positive_map': pm1, 'attention_mask': am},
    ]

    # compute_cls_loss=True only to exercise the (normally gated-off) cls kernel.
    losses = glip_loss_forward(logits, bbox_reg, centerness, dot_product_logits,
                               targets, anchors, captions=None,
                               compute_cls_loss=True)
    for v in losses.values():
        jax.block_until_ready(v)
    print("KERNEL_OK")
</pallas_src>

<mosaic_0001>
module attributes {stable_mosaic.version = 11 : i64} {
  func.func @_cls_focal_kernel(%arg0: i32, %arg1: i32, %arg2: memref<16x128xf32, #tpu.memory_space<vmem>>, %arg3: memref<16x128xbf16, #tpu.memory_space<vmem>>, %arg4: memref<1x1x1xf32, #tpu.memory_space<vmem>>, %arg5: memref<8x128xf32, #tpu.memory_space<vmem>>) attributes {dimension_semantics = [#tpu.dimension_semantics<parallel>, #tpu.dimension_semantics<arbitrary>], iteration_bounds = array<i64: 2, 1>, scalar_prefetch = 0 : i64, scratch_operands = 1 : i64, tpu.core_type = #tpu.core_type<tc>, window_params = [{transform_indices = @transform_0, window_bounds = array<i64: 16, 128>}, {transform_indices = @transform_1, window_bounds = array<i64: 16, 128>}, {transform_indices = @transform_2, window_bounds = array<i64: 1, 1, 1>}]} {
    %c0_i32 = arith.constant 0 : i32
    %0 = arith.cmpi eq, %arg1, %c0_i32 : i32
    %1 = arith.extui %0 : i1 to i32
    %c0_i32_0 = arith.constant 0 : i32
    %2 = arith.cmpi ne, %1, %c0_i32_0 : i32
    scf.if %2 {
      %cst_20 = arith.constant 0.000000e+00 : f32
      %50 = vector.broadcast %cst_20 : f32 to vector<8x128xf32>
      %c0_21 = arith.constant 0 : index
      %c0_22 = arith.constant 0 : index
      %51 = vector.load %arg5[%c0_21, %c0_22] : memref<8x128xf32, #tpu.memory_space<vmem>>, vector<8x128xf32>
      tpu.vector_store %arg5[%c0_21, %c0_22], %50 {strides = array<i32>} : memref<8x128xf32, #tpu.memory_space<vmem>>, vector<8x128xf32>,
    } else {
    }
    %c0 = arith.constant 0 : index
    %c0_1 = arith.constant 0 : index
    %3 = vector.load %arg2[%c0, %c0_1] : memref<16x128xf32, #tpu.memory_space<vmem>>, vector<16x128xf32>
    %c0_2 = arith.constant 0 : index
    %c0_3 = arith.constant 0 : index
    %4 = vector.load %arg3[%c0_2, %c0_3] : memref<16x128xbf16, #tpu.memory_space<vmem>>, vector<16x128xbf16>
    %5 = arith.extf %4 : vector<16x128xbf16> to vector<16x128xf32>
    %6 = arith.negf %3 : vector<16x128xf32>
    %7 = math.exp %6 : vector<16x128xf32>
    %cst = arith.constant 1.000000e+00 : f32
    %8 = vector.broadcast %cst : f32 to vector<16x128xf32>
    %9 = arith.addf %8, %7 : vector<16x128xf32>
    %10 = arith.divf %8, %9 : vector<16x128xf32>
    %cst_4 = arith.constant 1.000000e+00 : f32
    %11 = vector.broadcast %cst_4 : f32 to vector<16x128xf32>
    %12 = arith.subf %11, %10 : vector<16x128xf32>
    %13 = arith.mulf %12, %12 : vector<16x128xf32>
    %cst_5 = arith.constant 9.99999997E-7 : f32
    %14 = vector.broadcast %cst_5 : f32 to vector<16x128xf32>
    %15 = arith.addf %10, %14 : vector<16x128xf32>
    %16 = math.log %15 : vector<16x128xf32>
    %17 = arith.mulf %13, %16 : vector<16x128xf32>
    %18 = arith.mulf %10, %10 : vector<16x128xf32>
    %cst_6 = arith.constant 1.000000e+00 : f32
    %19 = vector.broadcast %cst_6 : f32 to vector<16x128xf32>
    %20 = arith.subf %19, %10 : vector<16x128xf32>
    %cst_7 = arith.constant 9.99999997E-7 : f32
    %21 = vector.broadcast %cst_7 : f32 to vector<16x128xf32>
    %22 = arith.addf %20, %21 : vector<16x128xf32>
    %23 = math.log %22 : vector<16x128xf32>
    %24 = arith.mulf %18, %23 : vector<16x128xf32>
    %cst_8 = arith.constant 1.000000e+00 : f32
    %25 = vector.broadcast %cst_8 : f32 to vector<16x128xf32>
    %26 = arith.cmpf oeq, %5, %25 : vector<16x128xf32>
    %27 = arith.extui %26 : vector<16x128xi1> to vector<16x128xi32>
    %28 = arith.sitofp %27 : vector<16x128xi32> to vector<16x128xf32>
    %cst_9 = arith.constant 2.000000e+00 : f32
    %29 = vector.broadcast %cst_9 : f32 to vector<16x128xf32>
    %30 = arith.cmpf oeq, %5, %29 : vector<16x128xf32>
    %31 = arith.extui %30 : vector<16x128xi1> to vector<16x128xi32>
    %32 = arith.sitofp %31 : vector<16x128xi32> to vector<16x128xf32>
    %cst_10 = arith.constant 0.000000e+00 : f32
    %33 = vector.broadcast %cst_10 : f32 to vector<16x128xf32>
    %34 = arith.subf %33, %28 : vector<16x128xf32>
    %35 = arith.mulf %34, %17 : vector<16x128xf32>
    %cst_11 = arith.constant 2.500000e-01 : f32
    %36 = vector.broadcast %cst_11 : f32 to vector<16x128xf32>
    %37 = arith.mulf %35, %36 : vector<16x128xf32>
    %38 = arith.mulf %32, %24 : vector<16x128xf32>
    %cst_12 = arith.constant 7.500000e-01 : f32
    %39 = vector.broadcast %cst_12 : f32 to vector<16x128xf32>
    %40 = arith.mulf %38, %39 : vector<16x128xf32>
    %41 = arith.subf %37, %40 : vector<16x128xf32>
    %c0_13 = arith.constant 0 : index
    %c0_14 = arith.constant 0 : index
    %42 = vector.load %arg5[%c0_13, %c0_14] : memref<8x128xf32, #tpu.memory_space<vmem>>, vector<8x128xf32>
    %43 = vector.shape_cast %41 : vector<16x128xf32> to vector<2x8x128xf32>
    %cst_15 = arith.constant dense<0.000000e+00> : vector<8x128xf32>
    %44 = vector.multi_reduction <add>, %43, %cst_15 [0] : vector<2x8x128xf32> to vector<8x128xf32>
    %45 = arith.addf %42, %44 : vector<8x128xf32>
    %c0_16 = arith.constant 0 : index
    %c0_17 = arith.constant 0 : index
    %46 = vector.load %arg5[%c0_16, %c0_17] : memref<8x128xf32, #tpu.memory_space<vmem>>, vector<8x128xf32>
    tpu.vector_store %arg5[%c0_16, %c0_17], %45 {strides = array<i32>} : memref<8x128xf32, #tpu.memory_space<vmem>>, vector<8x128xf32>,
    %c0_i32_18 = arith.constant 0 : i32
    %47 = arith.cmpi eq, %arg1, %c0_i32_18 : i32
    %48 = arith.extui %47 : i1 to i32
    %c0_i32_19 = arith.constant 0 : i32
    %49 = arith.cmpi ne, %48, %c0_i32_19 : i32
    scf.if %49 {
      %c0_20 = arith.constant 0 : index
      %c0_21 = arith.constant 0 : index
      %50 = vector.load %arg5[%c0_20, %c0_21] : memref<8x128xf32, #tpu.memory_space<vmem>>, vector<8x128xf32>
      %51 = vector.shape_cast %50 : vector<8x128xf32> to vector<1x8x128xf32>
      %cst_22 = arith.constant dense<0.000000e+00> : vector<1xf32>
      %52 = vector.multi_reduction <add>, %51, %cst_22 [1, 2] : vector<1x8x128xf32> to vector<1xf32>
      %53 = vector.shape_cast %52 : vector<1xf32> to vector<1x1x1xf32>
      %54 = vector.extract %53[0, 0, 0] : f32 from vector<1x1x1xf32>
      %55 = vector.broadcast %54 : f32 to vector<1x1xf32>
      %c0_23 = arith.constant 0 : index
      %c0_24 = arith.constant 0 : index
      %c0_25 = arith.constant 0 : index
      %56 = vector.load %arg4[%c0_23, %c0_24, %c0_25] : memref<1x1x1xf32, #tpu.memory_space<vmem>>, vector<1x1x1xf32>
      %57 = vector.shape_cast %56 : vector<1x1x1xf32> to vector<1x1xf32>
      %58 = vector.shape_cast %55 : vector<1x1xf32> to vector<1x1x1xf32>
      tpu.vector_store %arg4[%c0_23, %c0_24, %c0_25], %58 {strides = array<i32>} : memref<1x1x1xf32, #tpu.memory_space<vmem>>, vector<1x1x1xf32>,
    } else {
    }
    return
  }
  func.func @transform_0(%arg0: i32, %arg1: i32) -> (i32, i32) {
    %c1_i32 = arith.constant 1 : i32
    %0 = arith.muli %arg0, %c1_i32 : i32
    %1 = arith.addi %0, %arg1 : i32
    %c0_i32 = arith.constant 0 : i32
    %c0_i32_0 = arith.constant 0 : i32
    return %1, %c0_i32 : i32, i32
  }
  func.func @transform_1(%arg0: i32, %arg1: i32) -> (i32, i32) {
    %c1_i32 = arith.constant 1 : i32
    %0 = arith.muli %arg0, %c1_i32 : i32
    %1 = arith.addi %0, %arg1 : i32
    %c0_i32 = arith.constant 0 : i32
    %c0_i32_0 = arith.constant 0 : i32
    return %1, %c0_i32 : i32, i32
  }
  func.func @transform_2(%arg0: i32, %arg1: i32) -> (i32, i32, i32) {
    %c0_i32 = arith.constant 0 : i32
    %c0_i32_0 = arith.constant 0 : i32
    %c0_i32_1 = arith.constant 0 : i32
    return %arg0, %c0_i32, %c0_i32_0 : i32, i32, i32
  }
}

</mosaic_0001>

<bundles_post_ra>
// kernel: tpu_custom_call.1
= control target key start
LH: loop header
LB: loop body
LE: loop exit
PB: predicated region body
PF: predicated region fallthrough
CT: control target
= control target key end

     0   :  { %7 = vsyncpa [#allocation4], 0  ;;  %s792_s0 = inlined_call_operand.hbm [shape: f32[32,128], index: 0, kind: input, shape index: {}]   ;;  %s793_s1 = inlined_call_operand.hbm [shape: bf16[32,128], index: 1, kind: input, shape index: {}]   ;;  %s794_s2 = inlined_call_operand.vmem [shape: f32[2,1,1], index: 2, kind: output, shape index: {}]  }
   0x1   :  { %9 = vsyncpa [#allocation4 + $0x1], 0 }
   0x2   :  { %10 = vsyncpa [#allocation6], 0 }
   0x3   :  { %12 = vsyncpa [#allocation6 + $0x1], 0  ;;  %s679_s9 = smov 0   ;;  %s681_s10 = smov 0  }
   0x4   :  { %s683_s11 = smov 0   ;;  %s685_s12 = smov 0  }
   0x5   :  { %s687_s13 = smov 0   ;;  %s689_s14 = smov 0  }
   0x6 LB: > { %s433_s15 = sadd.s32 4294967295, %s657_s14   ;;  %s30_s16 = sadd.s32 1, %s653_s13  ;;  %s657_s14 = sphi %s689_s14, %s18_s14   ;;  %s653_s13 = sphi %s687_s13, %s802_s13   ;;  %s649_s12 = sphi %s685_s12, %s801_s12   ;;  %s645_s11 = sphi %s683_s11, %s800_s11   ;;  %s641_s10 = sphi %s681_s10, %s799_s10   ;;  %s637_s9 = sphi %s679_s9, %s798_s9  }
   0x7   : > { %p32_p0 = scmp.ge.s32.totalorder %s30_s16, 2  ;;  %s39_s17 = sadd.s32 1, %s645_s11 }
   0x8   : > { %p46_p1 = scmp.ne.s32.totalorder %s645_s11, %s641_s10  ;;  %p47_p2 = scmp.eq.s32.totalorder %s657_s14, 0 }
   0x9   : > { %s804_s16 = smov (%p32_p0, %s30_s16), 0  ;;  %p52_p4 = scmp.ne.s32.totalorder %s641_s10, %s637_s9 }
   0xa   : > { %p715_p3 = por %p47_p2, %p46_p1  ;;  %s36_s19 = ssub.s32 %s653_s13, %s804_s16 }
   0xb   : > { %p53_p5 = scmp.eq.s32.totalorder %s433_s15, 0  ;;  %p37_p6 = scmp.eq.s32.totalorder %s36_s19, 0 }
   0xc   : > { %p473_p8 = scmp.lt.s32.totalorder %s657_s14, 2  ;;  %s731_s22 = sand.u32 1, %s645_s11  }
   0xd   : > { %p722_p7 = por %p53_p5, %p52_p4  ;;  %s454_s23 = sshll.u32 %s653_s13, 4 }
   0xe   : > { %s728_s21 = scalar_select %p37_p6, %s645_s11, %s39_s17  }
   0xf   : > { %s437_s24 = sshll.u32 %s731_s22, 4  ;;  %s140_s27 = scalar_lea.hbm %s792_s0, %s454_s23 }
  0x10   : > { %s141_s28 = sshll.u32 %s140_s27, 4  ;;  %s134_s29 = scalar_lea.vmem [#allocation3], %s437_s24  ;;  %s142_s28 = int_to_ptr.hbm [resolvable:$true] %s141_s28 }
  0x11   : > { %s143_s30 = sshll.u32 %s134_s29, 4  ;;  %p740_p9 = pnand %p473_p8, %p715_p3  ;;  %s144_s30 = int_to_ptr.vmem [resolvable:$true] %s143_s30 }
  0x12   : > { %p443_p10 = scmp.ge.s32.totalorder %s657_s14, 1  ;;  %p174_p11 = scmp.lt.s32.totalorder %s657_s14, 3 }
  0x13   : > { %s131_s4 = scalar_lea.sflag [#allocation4], %s731_s22  ;;  %s659_s5 = smov 128  }
  0x14   : > { %s660_s6 = smov 8   ;;  %p175_p12 = pnand %p443_p10, %p174_p11 }
  0x15   : > { %469 = dma.hbm_to_vmem [thread:$0]  (!%p740_p9), %s142_s28, 256, %s144_s30, %s131_s4, %s659_s5, %s659_s5, %s660_s6  }
  0x16   : > { %s440_s7 = sshll.u32 %s731_s22, 3  ;;  %s455_s8 = sshll.u32 %s653_s13, 3 }
  0x17   : > { %s163_s17 = scalar_lea.hbm %s793_s1, %s455_s8  ;;  %s157_s19 = scalar_lea.vmem [#allocation5], %s440_s7 }
  0x18   : > { %s164_s18 = sshll.u32 %s163_s17, 4  ;;  %s166_s23 = sshll.u32 %s157_s19, 4  ;;  %s165_s18 = int_to_ptr.hbm [resolvable:$true] %s164_s18  ;;  %s167_s23 = int_to_ptr.vmem [resolvable:$true] %s166_s23 }
  0x19   : > { %s154_s24 = scalar_lea.sflag [#allocation6], %s731_s22  ;;  %s661_s25 = smov 64  }
  0x1a   : > { %s662_s26 = smov 4   ;;  %178 = sbr.rel (%p175_p12) target bundleno = 268 (0x10c), region = 28 }
  0x1b   : > { %472 = dma.hbm_to_vmem [thread:$0]  (!%p740_p9), %s165_s18, 128, %s167_s23, %s154_s24, %s661_s25, %s661_s25, %s662_s26  }
  0x1c   : > { %s180_s27 = sand.u32 (!%p175_p12), 1, %s641_s10  }
  0x1d   : > { %s444_s28 = sshll.u32 (!%p175_p12), %s180_s27, 4  ;;  %s181_s29 = scalar_lea.sflag (!%p175_p12), [#allocation4], %s180_s27 }
  0x1e   : > { %s184_s30 = scalar_lea.vmem (!%p175_p12), [#allocation3], %s444_s28 }
  0x1f   : > { %628 = dma.done.wait (%p722_p7), %s181_s29, 256  }
  0x20   : > { %630 = vsyncadd (%p722_p7), %s181_s29, 4294967040  ;;  %s445_s4 = sshll.u32 %s180_s27, 3  ;;  %s191_s5 = scalar_lea.sflag [#allocation6], %s180_s27 }
  0x21   : > { %s762_s22 = scalar_lea.vmem [#allocation5], %s445_s4 }
  0x22   : > { %632 = dma.done.wait (%p722_p7), %s191_s5, 128  }
  0x23   : > { %634 = vsyncadd (%p722_p7), %s191_s5, 4294967168  ;;  %v231_v0 = vld [vmem:[%s184_s30] sm:$0xff]  ;;  %v232_v1 = vld [vmem:[%s184_s30 + $0x8] sm:$0xff]  ;;  %v663_v37 = vmov 0.0   ;;  %p223_p13 = scmp.lt.s32.totalorder %s649_s12, 1  ;;  %vm339_vm12 = vcmask 0  }
  0x24   : > { %v446_v2 = vmul.f32 -1.442695, %v231_v0  ;;  %v447_v3 = vmul.f32 -1.442695, %v232_v1  ;;  %v457_v21 = vld [vmem:[%s762_s22] sm:$0xff]  }
  0x25   : > { %v458_v26 = vunpack.c.l.bf16 %v457_v21  ;;  %v459_v29 = vunpack.c.h.bf16 %v457_v21  ;;  %s806_s12 = smov (!%p223_p13, %s649_s12), 1 }
  0x26   : > { %527 = vpow2.f32 %v446_v2  ;;  %s225_s6 = scalar_lea.vmem %s794_s2, %s806_s12 }
  0x27   : > { %529 = vpow2.f32 %v447_v3  ;;  %vm297_vm8 = vcmp.eq.f32.partialorder %v458_v26, 1.0  ;;  %vm298_vm9 = vcmp.eq.f32.partialorder %v459_v29, 1.0  ;;  %vm303_vm10 = vcmp.eq.f32.partialorder %v458_v26, 2.0 }
  0x28   : > { %v448_v38 = vsel %vm297_vm8, 1.0, %v663_v37  ;;  %v449_v40 = vsel %vm298_vm9, 1.0, %v663_v37  ;;  %vm304_vm11 = vcmp.eq.f32.partialorder %v459_v29, 2.0  ;;  %v450_v56 = vsel %vm303_vm10, 1.0, %v663_v37 }
  0x29   : > { %v309_v46 = vsub.f32 0.0, %v448_v38  ;;  %v310_v50 = vsub.f32 0.0, %v449_v40  ;;  %v451_v58 = vsel %vm304_vm11, 1.0, %v663_v37 }
  0x2c   : > { %v528_v4 = vpop.eup %527 }
  0x2d   : > { %v530_v5 = vpop.eup %529  ;;  %v243_v6 = vadd.f32 1.0, %v528_v4 }
  0x2e   : > { %v244_v7 = vadd.f32 1.0, %v530_v5 }
  0x2f   : > { %531 = vrcp.f32 %v243_v6  ;;  %vm250_vm0 = vweird.f32 %v243_v6  ;;  %v256_v11 = vand.u32 2147483648, %v243_v6  ;;  %v254_v14 = vand.u32 2147483647, %v243_v6 }
  0x30   : > { %533 = vrcp.f32 %v244_v7  ;;  %v271_v15 = vand.u32 2147483648, %v244_v7  ;;  %vm265_vm2 = vweird.f32 %v244_v7  ;;  %v269_v17 = vand.u32 2147483647, %v244_v7 }
  0x31   : > { %v257_v19 = vor.u32 1.1754944e-38, %v256_v11  ;;  %vm255_vm5 = vcmp.eq.f32.partialorder %v254_v14, 8.507059e+37 }
  0x32   : > { %v272_v23 = vor.u32 1.1754944e-38, %v271_v15  ;;  %vm270_vm7 = vcmp.eq.f32.partialorder %v269_v17, 8.507059e+37 }
  0x35   : > { %v532_v8 = vpop.eup %531 }
  0x36   : > { %v534_v9 = vpop.eup %533  ;;  %v246_v10 = vmul.f32 %v532_v8, %v243_v6  ;;  %vm251_vm1 = vweird.f32 %v532_v8 }
  0x37   : > { %v261_v12 = vmul.f32 %v534_v9, %v244_v7  ;;  %vm266_vm3 = vweird.f32 %v534_v9  ;;  %vm252_vm4 = vmor %vm250_vm0, %vm251_vm1 }
  0x38   : > { %v247_v13 = vsub.f32 1.0, %v246_v10  ;;  %vm267_vm6 = vmor %vm265_vm2, %vm266_vm3 }
  0x39   : > { %v262_v16 = vsub.f32 1.0, %v261_v12 }
  0x3a   : > { %v248_v18 = vmul.f32 %v532_v8, %v247_v13 }
  0x3b   : > { %v263_v20 = vmul.f32 %v534_v9, %v262_v16 }
  0x3c   : > { %v249_v22 = vadd.f32 %v532_v8, %v248_v18 }
  0x3d   : > { %v264_v24 = vadd.f32 %v534_v9, %v263_v20 }
  0x3e   : > { %v253_v25 = vsel %vm252_vm4, %v532_v8, %v249_v22 }
  0x3f   : > { %v258_v27 = vsel %vm255_vm5, %v257_v19, %v253_v25  ;;  %v268_v28 = vsel %vm267_vm6, %v534_v9, %v264_v24 }
  0x40   : > { %v273_v30 = vsel %vm270_vm7, %v272_v23, %v268_v28  ;;  %v275_v31 = vsub.f32 1.0, %v258_v27  ;;  %v279_v32 = vadd.f32 1e-06, %v258_v27  ;;  %v287_v45 = vmul.f32 %v258_v27, %v258_v27 }
  0x41   : > { %v276_v33 = vsub.f32 1.0, %v273_v30  ;;  %v280_v34 = vadd.f32 1e-06, %v273_v30  ;;  %v288_v49 = vmul.f32 %v273_v30, %v273_v30 }
  0x42   : > { %535 = vlog2.f32 %v279_v32  ;;  %v289_v35 = vadd.f32 1e-06, %v275_v31  ;;  %v277_v39 = vmul.f32 %v275_v31, %v275_v31 }
  0x43   : > { %537 = vlog2.f32 %v280_v34  ;;  %v290_v36 = vadd.f32 1e-06, %v276_v33  ;;  %v278_v42 = vmul.f32 %v276_v33, %v276_v33 }
  0x44   : > { %539 = vlog2.f32 %v289_v35 }
  0x45   : > { %541 = vlog2.f32 %v290_v36 }
  0x48   : > { %v536_v41 = vpop.eup %535 }
  0x49   : > { %v538_v43 = vpop.eup %537  ;;  %v282_v44 = vmul.f32 0.6931472, %v536_v41 }
  0x4a   : > { %v540_v47 = vpop.eup %539  ;;  %v284_v48 = vmul.f32 0.6931472, %v538_v43 }
  0x4b   : > { %v542_v51 = vpop.eup %541  ;;  %v285_v52 = vmul.f32 %v282_v44, %v277_v39  ;;  %v292_v53 = vmul.f32 0.6931472, %v540_v47 }
  0x4c   : > { %v286_v54 = vmul.f32 %v284_v48, %v278_v42  ;;  %v294_v55 = vmul.f32 0.6931472, %v542_v51 }
  0x4d   : > { %v295_v57 = vmul.f32 %v292_v53, %v287_v45  ;;  %v311_v59 = vmul.f32 %v309_v46, %v285_v52 }
  0x4e   : > { %v296_v60 = vmul.f32 %v294_v55, %v288_v49  ;;  %v312_v61 = vmul.f32 %v310_v50, %v286_v54 }
  0x4f   : > { %v313_v62 = vmul.f32 0.25, %v311_v59  ;;  %v315_v63 = vmul.f32 %v450_v56, %v295_v57 }
  0x50   : > { %v314_v0 = vmul.f32 0.25, %v312_v61  ;;  %v316_v1 = vmul.f32 %v451_v58, %v296_v60 }
  0x51   : > { %v317_v2 = vmul.f32 0.75, %v315_v63 }
  0x52   : > { %v318_v3 = vmul.f32 0.75, %v316_v1 }
  0x53   : > { %v319_v4 = vsub.f32 %v313_v62, %v317_v2 }
  0x54   : > { %v320_v5 = vsub.f32 %v314_v0, %v318_v3 }
  0x56   : > { %v322_v6 = vadd.f32 %v320_v5, %v319_v4 }
  0x58   : > { %329 = vadd.xlane.f32.xlu0 %v322_v6 }
  0xcb   : > { %v330_v7 = vpop.xlane.xlu0 %329 }
  0xcc   : > { %v331_v8 = vrot.slane %v330_v7, 4 }
  0xce   : > { %v332_v9 = vadd.f32 %v331_v8, %v330_v7 }
  0xd0   : > { %v333_v10 = vrot.slane %v332_v9, 2 }
  0xd2   : > { %v334_v11 = vadd.f32 %v333_v10, %v332_v9 }
  0xd4   : > { %v335_v12 = vrot.slane %v334_v11, 1 }
  0xd6   : > { %v336_v13 = vadd.f32 %v335_v12, %v334_v11 }
  0xd8   : > { %460 = vpush %v336_v13 }
 0x109   : > { %s461_s7 = spop %460 }
 0x10a   : > { %v338_v14 = vstv %s461_s7 }
 0x10b   : > { %340 = vst.msk [vmem:[%s225_s6] sm:$0x1] %vm339_vm12, %v338_v14 }
 0x10c PF: > { %s18_s14 = sadd.s32 1, %s657_s14   ;;  %s798_s9 = smov %s641_s10 }
 0x10d   : > { %p15_p0 = scmp.ge.s32.totalorder %s18_s14, 4   ;;  %s799_s10 = smov %s645_s11 }
 0x10e   : > { %s800_s11 = smov %s728_s21  ;;  %s801_s12 = smov %s653_s13 }
 0x10f   : > { %s802_s13 = smov %s804_s16  ;;  %17 = sbr.rel (!%p15_p0) target bundleno = 6 (0x6), region = 89 }
 0x114   :  { %358 = vsyncpa [#allocation4], 1 }
 0x115   :  { %360 = vsyncpa [#allocation4 + $0x1], 1 }
 0x116   :  { %361 = vsyncpa [#allocation6], 1 }
 0x117   :  { %363 = vsyncpa [#allocation6 + $0x1], 1 }

</bundles_post_ra>
